<compile_context>
chip_gen: v7x
topology: tpu7x:2x2x1
jax: 0.10.0
libtpu: 0.0.40
codegen_flags: <defaults>
</compile_context>

<pallas_src>
import functools

import jax
import jax.numpy as jnp
from jax.experimental import pallas as pl
from jax.experimental.pallas import tpu as pltpu

EPS = 1e-5       # PyTorch LayerNorm default eps
LANES = 128      # TPU lane width
SUBLANES = 8     # TPU sublane height (f32)


def _round_up(n, m):
    return (n + m - 1) // m * m


def rnn_forward_kernel(tok_ref, params_ref, o_ref, *,
                       B_pad, S, D, H, V_pad, r_ih, r_hh, r_out, r_aff):
    # tok_ref:    (S*B_pad, 1) int32, time-major token ids (row t*B_pad + b = token (b, t))
    # params_ref: (R, 128) f32 packed parameter slab (all section starts 8-row aligned)
    # o_ref:      (B_pad, 128) f32 lane-dense logits (cols C..127 are zero)
    SB = S * B_pad

    # ---- static views into the packed parameter slab ----
    emb = params_ref[0:V_pad, :D]                                        # (V_pad, D)
    w_ih = params_ref[r_ih:r_ih + D, :H]                                 # (D, H)  pre-transposed
    w_hh = params_ref[r_hh:r_hh + H, :H]                                 # (H, H)  pre-transposed
    w_out = params_ref[r_out:r_out + H, :]                               # (H, 128) lane-dense
    g1 = params_ref[r_aff + 0:r_aff + 1, :D]
    b1 = params_ref[r_aff + 1:r_aff + 2, :D]
    g2 = params_ref[r_aff + 2:r_aff + 3, :H]
    b2 = params_ref[r_aff + 3:r_aff + 4, :H]
    b_out = params_ref[r_aff + 4:r_aff + 5, :]                           # (1, 128)

    # ---- embedding lookup fused as a one-hot matmul on the MXU (bf16 in, f32 acc) ----
    tok = tok_ref[...]                                                   # (SB, 1) int32
    onehot = (tok == jax.lax.broadcasted_iota(jnp.int32, (SB, V_pad), 1)
              ).astype(jnp.bfloat16)                                     # (SB, V_pad)
    x = jnp.dot(onehot, emb.astype(jnp.bfloat16),
                preferred_element_type=jnp.float32)                      # (SB, D) f32
    # TODO(synk): at production vocab sizes replace the one-hot matmul with a
    # scalar-prefetch DMA row gather (PrefetchScalarGridSpec + pl.Element on the
    # table) keeping the embedding table in HBM (memory_space=pl.ANY).

    # ---- bn1: LayerNorm over the embedding dim D (f32 statistics) ----
    mu1 = jnp.mean(x, axis=-1, keepdims=True)
    var1 = jnp.mean((x - mu1) ** 2, axis=-1, keepdims=True)
    xn = (x - mu1) * jax.lax.rsqrt(var1 + EPS) * g1 + b1                 # (SB, D)

    # ---- nn.RNN(vector_dim, hidden_side, bias=False, batch_first=True), tanh ----
    # Input projection hoisted out of the serial recurrence: one (SB, D) @ (D, H)
    # MXU matmul; per-step slices below are B_pad-row (8-aligned) static slices.
    xproj = jnp.dot(xn.astype(jnp.bfloat16), w_ih.astype(jnp.bfloat16),
                    preferred_element_type=jnp.float32)                  # (SB, H) f32

    w_hh_b = w_hh.astype(jnp.bfloat16)
    h = jnp.zeros((B_pad, H), jnp.float32)
    acc = jnp.zeros((B_pad, H), jnp.float32)
    # S is small & static -> unrolled; each step is one MXU push + EUP tanh.
    # TODO(synk): hold W_hh stationary in MXU weight regs (pltpu.matmul_push_rhs /
    # matmul_acc_lhs / matmul_pop) to remove per-step RHS staging from the serial
    # chain; switch to lax.fori_loop(unroll=True) with pl.ds(pl.multiple_of(...))
    # slicing if S grows beyond a handful.
    for t in range(S):
        xt = xproj[t * B_pad:(t + 1) * B_pad, :]                         # 8-aligned static slice
        h = jnp.tanh(xt + jnp.dot(h.astype(jnp.bfloat16), w_hh_b,
                                  preferred_element_type=jnp.float32))
        acc = acc + h
    # TODO(synk): the torch forward does `print(x)` on RNN outputs (debug side effect) - skipped.

    # ---- transpose(1,2) + AvgPool1d(S) + squeeze == mean over time ----
    pooled = acc * (1.0 / S)                                             # (B_pad, H)

    # ---- bn2: LayerNorm over hidden dim H ----
    mu2 = jnp.mean(pooled, axis=-1, keepdims=True)
    var2 = jnp.mean((pooled - mu2) ** 2, axis=-1, keepdims=True)
    pn = (pooled - mu2) * jax.lax.rsqrt(var2 + EPS) * g2 + b2            # (B_pad, H)

    # ---- Linear(hidden_side, sentence_length + 1), lane-dense (cols >= C are 0) ----
    y = jnp.dot(pn.astype(jnp.bfloat16), w_out.astype(jnp.bfloat16),
                preferred_element_type=jnp.float32) + b_out              # (B_pad, 128)
    o_ref[...] = y


def pack_params(params):
    """One-time repack of all parameters into a single lane-padded (R, 128) slab."""
    emb = jnp.asarray(params["embedding"], jnp.float32)   # (V, D)
    w_ih = jnp.asarray(params["w_ih"], jnp.float32)        # (D, H) pre-transposed
    w_hh = jnp.asarray(params["w_hh"], jnp.float32)        # (H, H) pre-transposed
    w_out = jnp.asarray(params["w_out"], jnp.float32)      # (H, C) pre-transposed
    V, D = emb.shape
    H = w_hh.shape[0]
    C = w_out.shape[1]
    assert max(D, H, C) <= LANES

    V_pad = _round_up(V, SUBLANES)
    r_ih = V_pad
    r_hh = r_ih + _round_up(D, SUBLANES)
    r_out = r_hh + _round_up(H, SUBLANES)
    r_aff = r_out + _round_up(H, SUBLANES)
    n_rows = r_aff + SUBLANES                               # 5 affine rows, padded to 8

    def fill(slab, row, a):
        r, c = a.shape
        return slab.at[row:row + r, :c].set(a)

    slab = jnp.zeros((n_rows, LANES), jnp.float32)
    slab = fill(slab, 0, emb)
    slab = fill(slab, r_ih, w_ih)
    slab = fill(slab, r_hh, w_hh)
    slab = fill(slab, r_out, w_out)
    slab = fill(slab, r_aff + 0, jnp.reshape(jnp.asarray(params["g1"], jnp.float32), (1, D)))
    slab = fill(slab, r_aff + 1, jnp.reshape(jnp.asarray(params["b1"], jnp.float32), (1, D)))
    slab = fill(slab, r_aff + 2, jnp.reshape(jnp.asarray(params["g2"], jnp.float32), (1, H)))
    slab = fill(slab, r_aff + 3, jnp.reshape(jnp.asarray(params["b2"], jnp.float32), (1, H)))
    slab = fill(slab, r_aff + 4, jnp.reshape(jnp.asarray(params["b_out"], jnp.float32), (1, C)))

    return {"slab": slab, "V_pad": V_pad, "D": D, "H": H, "C": C,
            "r_ih": r_ih, "r_hh": r_hh, "r_out": r_out, "r_aff": r_aff}


def torch_rnn_forward(x_tokens, packed):
    """Inference path of TorchRNN.forward (y=None): returns logits (B, S+1)."""
    B, S = x_tokens.shape
    D, H, C = packed["D"], packed["H"], packed["C"]
    assert C == S + 1

    # Pad the batch to a sublane multiple so every per-timestep slice in the kernel
    # is 8-row aligned; padded rows (token 0) are independent junk, sliced off below.
    B_pad = _round_up(max(B, SUBLANES), SUBLANES)
    tok = jnp.zeros((B_pad, S), jnp.int32).at[:B, :].set(x_tokens.astype(jnp.int32))
    tok_tm = tok.T.reshape(S * B_pad, 1)                    # time-major flat ids

    kernel = functools.partial(
        rnn_forward_kernel, B_pad=B_pad, S=S, D=D, H=H,
        V_pad=packed["V_pad"], r_ih=packed["r_ih"], r_hh=packed["r_hh"],
        r_out=packed["r_out"], r_aff=packed["r_aff"])
    vmem = pl.BlockSpec(memory_space=pltpu.MemorySpace.VMEM)

    # Gridless: tokens + packed params are a few tens of KiB -> one VMEM shot, two
    # input DMAs, one lane-dense (B_pad, 128) output store.
    # TODO(synk): at production batch sizes add grid=(B//B_tile,) with batch-tiled
    # BlockSpecs and dimension_semantics=("parallel",); prefer 256-row tiles on
    # v6e/v7x (256x256 MXU) vs 128 on v5e, and re-derive B_tile + vmem_limit_bytes
    # against v7x's 64 MiB VMEM (double-buffered inputs + resident weights).
    out = pl.pallas_call(
        kernel,
        out_shape=jax.ShapeDtypeStruct((B_pad, LANES), jnp.float32),
        in_specs=[vmem, vmem],
        out_specs=vmem,
    )(tok_tm, packed["slab"])

    return out[:B, :C]


# TODO(synk): training path (cross_entropy loss when y is not None) not implemented;
# only the y=None logits path is reproduced.


if __name__ == "__main__":
    # Small shapes consistent with the module's constructor.
    vocab_size = 30
    vector_dim = 16        # D
    sentence_length = 8    # S
    hidden_side = 32       # H
    batch = 2              # B

    key = jax.random.PRNGKey(0)
    k_emb, k_ih, k_hh, k_out, k_x = jax.random.split(key, 5)

    params = {
        "embedding": 0.1 * jax.random.normal(k_emb, (vocab_size, vector_dim), jnp.float32),
        # LayerNorm affine params (PyTorch init: weight=1, bias=0)
        "g1": jnp.ones((1, vector_dim), jnp.float32),
        "b1": jnp.zeros((1, vector_dim), jnp.float32),
        # RNN weights, stored transposed: (D, H) and (H, H)
        "w_ih": 0.1 * jax.random.normal(k_ih, (vector_dim, hidden_side), jnp.float32),
        "w_hh": 0.1 * jax.random.normal(k_hh, (hidden_side, hidden_side), jnp.float32),
        "g2": jnp.ones((1, hidden_side), jnp.float32),
        "b2": jnp.zeros((1, hidden_side), jnp.float32),
        # Linear(hidden_side, sentence_length+1), stored transposed: (H, S+1)
        "w_out": 0.1 * jax.random.normal(k_out, (hidden_side, sentence_length + 1), jnp.float32),
        "b_out": jnp.zeros((1, sentence_length + 1), jnp.float32),
    }

    packed = pack_params(params)
    x_tokens = jax.random.randint(k_x, (batch, sentence_length), 0, vocab_size, dtype=jnp.int32)

    y_pred = torch_rnn_forward(x_tokens, packed)
    jax.block_until_ready(y_pred)
    assert y_pred.shape == (batch, sentence_length + 1)
    print("KERNEL_OK")
</pallas_src>

<mosaic_0001>
module attributes {stable_mosaic.version = 11 : i64} {
  func.func @rnn_forward_kernel(%arg0: memref<64x1xi32, #tpu.memory_space<vmem>>, %arg1: memref<120x128xf32, #tpu.memory_space<vmem>>, %arg2: memref<8x128xf32, #tpu.memory_space<vmem>>) attributes {dimension_semantics = [], scalar_prefetch = 0 : i64, scratch_operands = 0 : i64, tpu.core_type = #tpu.core_type<tc>} {
    %c0 = arith.constant 0 : index
    %c0_0 = arith.constant 0 : index
    %0 = vector.load %arg1[%c0, %c0_0] : memref<120x128xf32, #tpu.memory_space<vmem>>, vector<32x16xf32>
    %c32 = arith.constant 32 : index
    %c0_1 = arith.constant 0 : index
    %1 = vector.load %arg1[%c32, %c0_1] : memref<120x128xf32, #tpu.memory_space<vmem>>, vector<16x32xf32>
    %c48 = arith.constant 48 : index
    %c0_2 = arith.constant 0 : index
    %2 = vector.load %arg1[%c48, %c0_2] : memref<120x128xf32, #tpu.memory_space<vmem>>, vector<32x32xf32>
    %c80 = arith.constant 80 : index
    %c0_3 = arith.constant 0 : index
    %3 = vector.load %arg1[%c80, %c0_3] : memref<120x128xf32, #tpu.memory_space<vmem>>, vector<32x128xf32>
    %c112 = arith.constant 112 : index
    %c0_4 = arith.constant 0 : index
    %4 = vector.load %arg1[%c112, %c0_4] : memref<120x128xf32, #tpu.memory_space<vmem>>, vector<1x16xf32>
    %c113 = arith.constant 113 : index
    %c0_5 = arith.constant 0 : index
    %5 = vector.load %arg1[%c113, %c0_5] : memref<120x128xf32, #tpu.memory_space<vmem>>, vector<1x16xf32>
    %c114 = arith.constant 114 : index
    %c0_6 = arith.constant 0 : index
    %6 = vector.load %arg1[%c114, %c0_6] : memref<120x128xf32, #tpu.memory_space<vmem>>, vector<1x32xf32>
    %c115 = arith.constant 115 : index
    %c0_7 = arith.constant 0 : index
    %7 = vector.load %arg1[%c115, %c0_7] : memref<120x128xf32, #tpu.memory_space<vmem>>, vector<1x32xf32>
    %c116 = arith.constant 116 : index
    %c0_8 = arith.constant 0 : index
    %8 = vector.load %arg1[%c116, %c0_8] : memref<120x128xf32, #tpu.memory_space<vmem>>, vector<1x128xf32>
    %c0_9 = arith.constant 0 : index
    %c0_10 = arith.constant 0 : index
    %9 = vector.load %arg0[%c0_9, %c0_10] : memref<64x1xi32, #tpu.memory_space<vmem>>, vector<64x1xi32>
    %10 = tpu.iota {dimensions = array<i32: 1>} : vector<64x32xi32>
    %11 = vector.broadcast %9 : vector<64x1xi32> to vector<64x32xi32>
    %12 = arith.cmpi eq, %11, %10 : vector<64x32xi32>
    %13 = arith.extui %12 : vector<64x32xi1> to vector<64x32xi32>
    %14 = arith.sitofp %13 : vector<64x32xi32> to vector<64x32xf32>
    %15 = arith.truncf %14 : vector<64x32xf32> to vector<64x32xbf16>
    %16 = arith.truncf %0 : vector<32x16xf32> to vector<32x16xbf16>
    %cst = arith.constant dense<0.000000e+00> : vector<64x16xf32>
    %17 = tpu.matmul %15, %16, %cst {dimension_numbers = #tpu.dot_dimension_numbers<[1], [0], [0], [1], [0, 0, 1, 1], [], []>} : vector<64x32xbf16>, vector<32x16xbf16>, vector<64x16xf32> -> vector<64x16xf32>
    %cst_11 = arith.constant dense<0.000000e+00> : vector<64xf32>
    %18 = vector.multi_reduction <add>, %17, %cst_11 [1] : vector<64x16xf32> to vector<64xf32>
    %19 = vector.shape_cast %18 : vector<64xf32> to vector<64x1xf32>
    %cst_12 = arith.constant 1.600000e+01 : f32
    %20 = vector.broadcast %cst_12 : f32 to vector<64x1xf32>
    %21 = arith.divf %19, %20 : vector<64x1xf32>
    %22 = vector.broadcast %21 : vector<64x1xf32> to vector<64x16xf32>
    %23 = arith.subf %17, %22 : vector<64x16xf32>
    %24 = arith.mulf %23, %23 : vector<64x16xf32>
    %cst_13 = arith.constant dense<0.000000e+00> : vector<64xf32>
    %25 = vector.multi_reduction <add>, %24, %cst_13 [1] : vector<64x16xf32> to vector<64xf32>
    %26 = vector.shape_cast %25 : vector<64xf32> to vector<64x1xf32>
    %cst_14 = arith.constant 1.600000e+01 : f32
    %27 = vector.broadcast %cst_14 : f32 to vector<64x1xf32>
    %28 = arith.divf %26, %27 : vector<64x1xf32>
    %29 = vector.broadcast %21 : vector<64x1xf32> to vector<64x16xf32>
    %30 = arith.subf %17, %29 : vector<64x16xf32>
    %cst_15 = arith.constant 9.99999974E-6 : f32
    %31 = vector.broadcast %cst_15 : f32 to vector<64x1xf32>
    %32 = arith.addf %28, %31 : vector<64x1xf32>
    %33 = math.rsqrt %32 : vector<64x1xf32>
    %34 = vector.broadcast %33 : vector<64x1xf32> to vector<64x16xf32>
    %35 = arith.mulf %30, %34 : vector<64x16xf32>
    %36 = vector.broadcast %4 : vector<1x16xf32> to vector<64x16xf32>
    %37 = arith.mulf %35, %36 : vector<64x16xf32>
    %38 = vector.broadcast %5 : vector<1x16xf32> to vector<64x16xf32>
    %39 = arith.addf %37, %38 : vector<64x16xf32>
    %40 = arith.truncf %39 : vector<64x16xf32> to vector<64x16xbf16>
    %41 = arith.truncf %1 : vector<16x32xf32> to vector<16x32xbf16>
    %cst_16 = arith.constant dense<0.000000e+00> : vector<64x32xf32>
    %42 = tpu.matmul %40, %41, %cst_16 {dimension_numbers = #tpu.dot_dimension_numbers<[1], [0], [0], [1], [0, 0, 1, 1], [], []>} : vector<64x16xbf16>, vector<16x32xbf16>, vector<64x32xf32> -> vector<64x32xf32>
    %43 = arith.truncf %2 : vector<32x32xf32> to vector<32x32xbf16>
    %cst_17 = arith.constant 0.000000e+00 : f32
    %44 = vector.broadcast %cst_17 : f32 to vector<8x32xf32>
    %cst_18 = arith.constant 0.000000e+00 : f32
    %45 = vector.broadcast %cst_18 : f32 to vector<8x32xf32>
    %46 = vector.extract_strided_slice %42 {offsets = [0, 0], sizes = [8, 32], strides = [1, 1]} : vector<64x32xf32> to vector<8x32xf32>
    %47 = arith.truncf %44 : vector<8x32xf32> to vector<8x32xbf16>
    %cst_19 = arith.constant dense<0.000000e+00> : vector<8x32xf32>
    %48 = tpu.matmul %47, %43, %cst_19 {dimension_numbers = #tpu.dot_dimension_numbers<[1], [0], [0], [1], [0, 0, 1, 1], [], []>} : vector<8x32xbf16>, vector<32x32xbf16>, vector<8x32xf32> -> vector<8x32xf32>
    %49 = arith.addf %46, %48 : vector<8x32xf32>
    %50 = math.tanh %49 : vector<8x32xf32>
    %51 = arith.addf %45, %50 : vector<8x32xf32>
    %52 = vector.extract_strided_slice %42 {offsets = [8, 0], sizes = [8, 32], strides = [1, 1]} : vector<64x32xf32> to vector<8x32xf32>
    %53 = arith.truncf %50 : vector<8x32xf32> to vector<8x32xbf16>
    %cst_20 = arith.constant dense<0.000000e+00> : vector<8x32xf32>
    %54 = tpu.matmul %53, %43, %cst_20 {dimension_numbers = #tpu.dot_dimension_numbers<[1], [0], [0], [1], [0, 0, 1, 1], [], []>} : vector<8x32xbf16>, vector<32x32xbf16>, vector<8x32xf32> -> vector<8x32xf32>
    %55 = arith.addf %52, %54 : vector<8x32xf32>
    %56 = math.tanh %55 : vector<8x32xf32>
    %57 = arith.addf %51, %56 : vector<8x32xf32>
    %58 = vector.extract_strided_slice %42 {offsets = [16, 0], sizes = [8, 32], strides = [1, 1]} : vector<64x32xf32> to vector<8x32xf32>
    %59 = arith.truncf %56 : vector<8x32xf32> to vector<8x32xbf16>
    %cst_21 = arith.constant dense<0.000000e+00> : vector<8x32xf32>
    %60 = tpu.matmul %59, %43, %cst_21 {dimension_numbers = #tpu.dot_dimension_numbers<[1], [0], [0], [1], [0, 0, 1, 1], [], []>} : vector<8x32xbf16>, vector<32x32xbf16>, vector<8x32xf32> -> vector<8x32xf32>
    %61 = arith.addf %58, %60 : vector<8x32xf32>
    %62 = math.tanh %61 : vector<8x32xf32>
    %63 = arith.addf %57, %62 : vector<8x32xf32>
    %64 = vector.extract_strided_slice %42 {offsets = [24, 0], sizes = [8, 32], strides = [1, 1]} : vector<64x32xf32> to vector<8x32xf32>
    %65 = arith.truncf %62 : vector<8x32xf32> to vector<8x32xbf16>
    %cst_22 = arith.constant dense<0.000000e+00> : vector<8x32xf32>
    %66 = tpu.matmul %65, %43, %cst_22 {dimension_numbers = #tpu.dot_dimension_numbers<[1], [0], [0], [1], [0, 0, 1, 1], [], []>} : vector<8x32xbf16>, vector<32x32xbf16>, vector<8x32xf32> -> vector<8x32xf32>
    %67 = arith.addf %64, %66 : vector<8x32xf32>
    %68 = math.tanh %67 : vector<8x32xf32>
    %69 = arith.addf %63, %68 : vector<8x32xf32>
    %70 = vector.extract_strided_slice %42 {offsets = [32, 0], sizes = [8, 32], strides = [1, 1]} : vector<64x32xf32> to vector<8x32xf32>
    %71 = arith.truncf %68 : vector<8x32xf32> to vector<8x32xbf16>
    %cst_23 = arith.constant dense<0.000000e+00> : vector<8x32xf32>
    %72 = tpu.matmul %71, %43, %cst_23 {dimension_numbers = #tpu.dot_dimension_numbers<[1], [0], [0], [1], [0, 0, 1, 1], [], []>} : vector<8x32xbf16>, vector<32x32xbf16>, vector<8x32xf32> -> vector<8x32xf32>
    %73 = arith.addf %70, %72 : vector<8x32xf32>
    %74 = math.tanh %73 : vector<8x32xf32>
    %75 = arith.addf %69, %74 : vector<8x32xf32>
    %76 = vector.extract_strided_slice %42 {offsets = [40, 0], sizes = [8, 32], strides = [1, 1]} : vector<64x32xf32> to vector<8x32xf32>
    %77 = arith.truncf %74 : vector<8x32xf32> to vector<8x32xbf16>
    %cst_24 = arith.constant dense<0.000000e+00> : vector<8x32xf32>
    %78 = tpu.matmul %77, %43, %cst_24 {dimension_numbers = #tpu.dot_dimension_numbers<[1], [0], [0], [1], [0, 0, 1, 1], [], []>} : vector<8x32xbf16>, vector<32x32xbf16>, vector<8x32xf32> -> vector<8x32xf32>
    %79 = arith.addf %76, %78 : vector<8x32xf32>
    %80 = math.tanh %79 : vector<8x32xf32>
    %81 = arith.addf %75, %80 : vector<8x32xf32>
    %82 = vector.extract_strided_slice %42 {offsets = [48, 0], sizes = [8, 32], strides = [1, 1]} : vector<64x32xf32> to vector<8x32xf32>
    %83 = arith.truncf %80 : vector<8x32xf32> to vector<8x32xbf16>
    %cst_25 = arith.constant dense<0.000000e+00> : vector<8x32xf32>
    %84 = tpu.matmul %83, %43, %cst_25 {dimension_numbers = #tpu.dot_dimension_numbers<[1], [0], [0], [1], [0, 0, 1, 1], [], []>} : vector<8x32xbf16>, vector<32x32xbf16>, vector<8x32xf32> -> vector<8x32xf32>
    %85 = arith.addf %82, %84 : vector<8x32xf32>
    %86 = math.tanh %85 : vector<8x32xf32>
    %87 = arith.addf %81, %86 : vector<8x32xf32>
    %88 = vector.extract_strided_slice %42 {offsets = [56, 0], sizes = [8, 32], strides = [1, 1]} : vector<64x32xf32> to vector<8x32xf32>
    %89 = arith.truncf %86 : vector<8x32xf32> to vector<8x32xbf16>
    %cst_26 = arith.constant dense<0.000000e+00> : vector<8x32xf32>
    %90 = tpu.matmul %89, %43, %cst_26 {dimension_numbers = #tpu.dot_dimension_numbers<[1], [0], [0], [1], [0, 0, 1, 1], [], []>} : vector<8x32xbf16>, vector<32x32xbf16>, vector<8x32xf32> -> vector<8x32xf32>
    %91 = arith.addf %88, %90 : vector<8x32xf32>
    %92 = math.tanh %91 : vector<8x32xf32>
    %93 = arith.addf %87, %92 : vector<8x32xf32>
    %cst_27 = arith.constant 1.250000e-01 : f32
    %94 = vector.broadcast %cst_27 : f32 to vector<8x32xf32>
    %95 = arith.mulf %93, %94 : vector<8x32xf32>
    %cst_28 = arith.constant dense<0.000000e+00> : vector<8xf32>
    %96 = vector.multi_reduction <add>, %95, %cst_28 [1] : vector<8x32xf32> to vector<8xf32>
    %97 = vector.shape_cast %96 : vector<8xf32> to vector<8x1xf32>
    %cst_29 = arith.constant 3.200000e+01 : f32
    %98 = vector.broadcast %cst_29 : f32 to vector<8x1xf32>
    %99 = arith.divf %97, %98 : vector<8x1xf32>
    %100 = vector.broadcast %99 : vector<8x1xf32> to vector<8x32xf32>
    %101 = arith.subf %95, %100 : vector<8x32xf32>
    %102 = arith.mulf %101, %101 : vector<8x32xf32>
    %cst_30 = arith.constant dense<0.000000e+00> : vector<8xf32>
    %103 = vector.multi_reduction <add>, %102, %cst_30 [1] : vector<8x32xf32> to vector<8xf32>
    %104 = vector.shape_cast %103 : vector<8xf32> to vector<8x1xf32>
    %cst_31 = arith.constant 3.200000e+01 : f32
    %105 = vector.broadcast %cst_31 : f32 to vector<8x1xf32>
    %106 = arith.divf %104, %105 : vector<8x1xf32>
    %107 = vector.broadcast %99 : vector<8x1xf32> to vector<8x32xf32>
    %108 = arith.subf %95, %107 : vector<8x32xf32>
    %cst_32 = arith.constant 9.99999974E-6 : f32
    %109 = vector.broadcast %cst_32 : f32 to vector<8x1xf32>
    %110 = arith.addf %106, %109 : vector<8x1xf32>
    %111 = math.rsqrt %110 : vector<8x1xf32>
    %112 = vector.broadcast %111 : vector<8x1xf32> to vector<8x32xf32>
    %113 = arith.mulf %108, %112 : vector<8x32xf32>
    %114 = vector.broadcast %6 : vector<1x32xf32> to vector<8x32xf32>
    %115 = arith.mulf %113, %114 : vector<8x32xf32>
    %116 = vector.broadcast %7 : vector<1x32xf32> to vector<8x32xf32>
    %117 = arith.addf %115, %116 : vector<8x32xf32>
    %118 = arith.truncf %117 : vector<8x32xf32> to vector<8x32xbf16>
    %119 = arith.truncf %3 : vector<32x128xf32> to vector<32x128xbf16>
    %cst_33 = arith.constant dense<0.000000e+00> : vector<8x128xf32>
    %120 = tpu.matmul %118, %119, %cst_33 {dimension_numbers = #tpu.dot_dimension_numbers<[1], [0], [0], [1], [0, 0, 1, 1], [], []>} : vector<8x32xbf16>, vector<32x128xbf16>, vector<8x128xf32> -> vector<8x128xf32>
    %121 = vector.broadcast %8 : vector<1x128xf32> to vector<8x128xf32>
    %122 = arith.addf %120, %121 : vector<8x128xf32>
    %c0_34 = arith.constant 0 : index
    %c0_35 = arith.constant 0 : index
    %123 = vector.load %arg2[%c0_34, %c0_35] : memref<8x128xf32, #tpu.memory_space<vmem>>, vector<8x128xf32>
    tpu.vector_store %arg2[%c0_34, %c0_35], %122 {strides = array<i32>} : memref<8x128xf32, #tpu.memory_space<vmem>>, vector<8x128xf32>,
    return
  }
}

</mosaic_0001>

<bundles_post_ra>
// kernel: tpu_custom_call.1
= control target key start
LH: loop header
LB: loop body
LE: loop exit
PB: predicated region body
PF: predicated region fallthrough
CT: control target
= control target key end

     0   :  { %7 = vsyncpa [#allocation3], 0  ;;  %s1343_s0 = inlined_call_operand.vmem [shape: s32[64,1], index: 0, kind: input, shape index: {}]   ;;  %s1344_s1 = inlined_call_operand.hbm [shape: f32[120,128], index: 1, kind: input, shape index: {}]   ;;  %s1345_s2 = inlined_call_operand.hbm [shape: f32[8,128], index: 2, kind: output, shape index: {}]  }
   0x1   :  { %8 = vsyncpa [#allocation4], 0  ;;  %s1120_s9 = smov [#allocation2]   ;;  %s1072_s13 = scalar_lea.hbm %s1344_s1, 1920 }
   0x2   :  { %s16_s10 = sshll.u32 %s1120_s9, 4  ;;  %p1073_p0 = scmp.ne.s32.totalorder %s1344_s1, %s1072_s13  ;;  %s17_s10 = int_to_ptr.vmem [resolvable:$true] %s16_s10 }
   0x3   :  { %p1076_p1 = scmp.lt.u32.totalorder %s1072_s13, %s1344_s1 }
   0x5   :  { %p1078_p2 = pnand %p1076_p1, %p1073_p0 }
   0x7   :  { %1081 = shalt.err (!%p1078_p2)
}
   0x8   :  { %s1082_s18 = scalar_lea.vmem %s17_s10, 1920  ;;  %p1087_p4 = scmp.lt.s32.totalorder %s17_s10, %s17_s10 }
   0x9   :  { %p1083_p3 = scmp.ne.s32.totalorder %s17_s10, %s1082_s18  ;;  %p1088_p5 = scmp.lt.s32.totalorder %s1082_s18, %s1082_s18 }
   0xb   :  { %p1089_p6 = por %p1088_p5, %p1087_p4 }
   0xd   :  { %p1090_p7 = pnand %p1089_p6, %p1083_p3 }
   0xf   :  { %1093 = shalt.err (!%p1090_p7)
}
  0x10   :  { %s1121_s19 = smov 128   ;;  %s1122_s20 = smov 8  }
  0x11   :  { %22 = dma.hbm_to_vmem [thread:$0]  %s1344_s1, 1920, %s17_s10, [#allocation3], %s1121_s19, %s1121_s19, %s1122_s20  }
  0x12   :  { %1116 = dma.done.wait [#allocation3], 1920  }
  0x13   :  { %1117 = vsyncadd [#allocation3], 4294965376  ;;  %v1123_v0 = vmov 0   ;;  %v48_v1 = vld [vmem:[%s1343_s0 + $0x10] sm:$0xff]  ;;  %v46_v2 = vld [vmem:[%s1343_s0] sm:$0xff]  ;;  %v1124_v15 = vmov 0.0   ;;  %v54_v16 = vlaneseq }
  0x14   :  { %1037 = vset.pattern.permute.xlu1 %v1123_v0  ;;  %1036 = vset.pattern.permute.xlu0 %v1123_v0  ;;  %v49_v3 = vld [vmem:[%s1343_s0 + $0x18] sm:$0xff]  ;;  %v47_v4 = vld [vmem:[%s1343_s0 + $0x8] sm:$0xff]  ;;  %v27_v5 = vld [vmem:[#allocation2] sm:$0xff]  ;;  %vm110_vm4 = vcmask 261120   ;;  %vm188_vm9 = vcmask 130048   ;;  %vm1125_vm10 = vmmov 0  }
  0x15   :  { %63 = vperm.xlu1 %1037, %v48_v1   ;;  %57 = vperm.xlu0 %1036, %v46_v2   ;;  %v28_v6 = vld [vmem:[#allocation2 + $0x8] sm:$0xff]  ;;  %v29_v7 = vld [vmem:[#allocation2 + $0x10] sm:$0xff]  ;;  %v30_v8 = vld [vmem:[#allocation2 + $0x18] sm:$0xff]  ;;  %v55_v17 = vand.u32 127, %v54_v16 }
  0x16   :  { %v108_v9 = vpack.c.bf16 %v28_v6, %v27_v5  ;;  %v109_v10 = vpack.c.bf16 %v30_v8, %v29_v7  ;;  %v51_v11 = vld [vmem:[%s1343_s0 + $0x28] sm:$0xff]  ;;  %v50_v12 = vld [vmem:[%s1343_s0 + $0x20] sm:$0xff]  ;;  %v53_v13 = vld [vmem:[%s1343_s0 + $0x38] sm:$0xff] }
  0x17   :  { %v52_v14 = vld [vmem:[%s1343_s0 + $0x30] sm:$0xff]  ;;  %s1126_s0 = smov [#allocation5]  }
  0x18   :  { %935 = vmatprep.subr.bf16.mxu0 %v108_v9  ;;  %s859_s10 = sshll.u32 %s1126_s0, 4  ;;  %s860_s10 = int_to_ptr.vmem [resolvable:$true] %s859_s10 }
  0x19   :  { %66 = vperm.xlu1 %1037, %v49_v3   ;;  %60 = vperm.xlu0 %1036, %v47_v4   ;;  %s1094_s11 = scalar_lea.vmem %s860_s10, 128  ;;  %p1099_p9 = scmp.lt.s32.totalorder %s860_s10, %s860_s10 }
  0x1a   :  { %936 = vmatpush3.bf16.msra.mxu0 %v108_v9  ;;  %p1095_p8 = scmp.ne.s32.totalorder %s860_s10, %s1094_s11  ;;  %p1100_p10 = scmp.lt.s32.totalorder %s1094_s11, %s1094_s11 }
  0x1b   :  { %937 = vmatprep.subr.bf16.mxu0 %v109_v10 }
  0x1c   :  { %p1101_p11 = por %p1100_p10, %p1099_p9 }
  0x1d   :  { %72 = vperm.xlu1 %1037, %v51_v11   ;;  %69 = vperm.xlu0 %1036, %v50_v12  }
  0x1e   :  { %938 = vmatpush3.bf16.msra.mxu0 %v109_v10  ;;  %p1102_p12 = pnand %p1101_p11, %p1095_p8 }
  0x1f   :  { %965 = vmatprep.subr.bf16.mxu0 %v1124_v15 }
  0x21   :  { %78 = vperm.xlu1 %1037, %v53_v13   ;;  %75 = vperm.xlu0 %1036, %v52_v14  }
  0x94   :  { %v64_v18 = vpop.permute.xlu1 %63  ;;  %v58_v19 = vpop.permute.xlu0 %57 }
  0x95   :  { %vm82_vm0 = vcmp.eq.s32.totalorder %v64_v18, %v55_v17  ;;  %vm80_vm1 = vcmp.eq.s32.totalorder %v58_v19, %v55_v17 }
  0x96   :  { %v870_v22 = vsel %vm82_vm0, 1.0, %v1124_v15  ;;  %v868_v23 = vsel %vm80_vm1, 1.0, %v1124_v15 }
  0x98   :  { %v67_v20 = vpop.permute.xlu1 %66  ;;  %v61_v21 = vpop.permute.xlu0 %60 }
  0x99   :  { %vm83_vm2 = vcmp.eq.s32.totalorder %v67_v20, %v55_v17  ;;  %vm81_vm3 = vcmp.eq.s32.totalorder %v61_v21, %v55_v17 }
  0x9a   :  { %v871_v24 = vsel %vm83_vm2, 1.0, %v1124_v15  ;;  %v869_v25 = vsel %vm81_vm3, 1.0, %v1124_v15 }
  0x9b   :  { %v105_v26 = vpack.c.bf16 %v871_v24, %v870_v22  ;;  %v104_v27 = vpack.c.bf16 %v869_v25, %v868_v23 }
  0x9c   :  { %v73_v28 = vpop.permute.xlu1 %72  ;;  %v70_v29 = vpop.permute.xlu0 %69 }
  0x9d   :  { %vm85_vm5 = vcmp.eq.s32.totalorder %v73_v28, %v55_v17  ;;  %vm84_vm6 = vcmp.eq.s32.totalorder %v70_v29, %v55_v17  ;;  %939 = vmatprep.mubr.msk.bf16.mxu0 %vm110_vm4, %v104_v27 }
  0x9e   :  { %v873_v30 = vsel %vm85_vm5, 1.0, %v1124_v15  ;;  %v872_v31 = vsel %vm84_vm6, 1.0, %v1124_v15  ;;  %940 = vmatmul.mubr.msk.bf16.vlgmr.msra.gmra.mrb[0].mxu0 %vm110_vm4, %v105_v26 }
  0x9f   :  { %v106_v32 = vpack.c.bf16 %v873_v30, %v872_v31 }
  0xa0   :  { %v79_v33 = vpop.permute.xlu1 %78  ;;  %v76_v34 = vpop.permute.xlu0 %75 }
  0xa1   :  { %vm87_vm7 = vcmp.eq.s32.totalorder %v79_v33, %v55_v17  ;;  %vm86_vm8 = vcmp.eq.s32.totalorder %v76_v34, %v55_v17  ;;  %943 = vmatprep.mubr.msk.bf16.mxu0 %vm110_vm4, %v106_v32  ;;  %v31_v32 = vld [vmem:[#allocation2 + $0x20] sm:$0xff]  ;;  %v32_v33 = vld [vmem:[#allocation2 + $0x28] sm:$0xff] }
  0xa2   :  { %v875_v35 = vsel %vm87_vm7, 1.0, %v1124_v15  ;;  %v874_v36 = vsel %vm86_vm8, 1.0, %v1124_v15  ;;  %v322_v34 = vpack.c.bf16 %v32_v33, %v31_v32 }
  0xa3   :  { %v107_v37 = vpack.c.bf16 %v875_v35, %v874_v36  ;;  %v33_v35 = vld [vmem:[#allocation2 + $0x30] sm:$0xff]  ;;  %v34_v36 = vld [vmem:[#allocation2 + $0x38] sm:$0xff] }
  0xa4   :  { %947 = vmatprep.subr.bf16.mxu1 %v322_v34 }
  0xa5   :  { %948 = vmatpush3.bf16.msra.mxu1 %v322_v34 }
  0xa6   :  { %944 = vmatmul.mubr.msk.bf16.gmra.mrb[4].mxu0 %vm110_vm4, %v107_v37  ;;  %957 = vmatprep.subr.bf16.mxu1 %v1124_v15  ;;  %v1242_v37 = vpack.c.bf16 %v34_v36, %v33_v35 }
  0xa7   :  { %969 = vmatprep.mubr.msk.bf16.mxu0 %vm1125_vm10, %v1124_v15 }
  0xa8   :  { %966 = vmatpush3.bf16.msra.mxu0 %v1242_v37 }
  0xa9   :  { %967 = vmatprep.subr.bf16.mxu0 %v1124_v15 }
 0x171   :  { %v941_v38 = vpop.f32.mrb[0].mxu0 }
 0x172   :  { %v157_v39 = vpop.f32.mrb[1].mxu0  ;;  %v195_v44 = vsel %vm188_vm9, %v941_v38, 0.0 }
 0x173   :  { %v942_v40 = vpop.f32.mrb[2].mxu0  ;;  %v189_v41 = vsel %vm188_vm9, %v157_v39, 0.0 }
 0x174   :  { %190 = vadd.xlane.f32.xlu0 %v189_v41  ;;  %v160_v42 = vpop.f32.mrb[3].mxu0  ;;  %v198_v48 = vsel %vm188_vm9, %v942_v40, 0.0 }
 0x175   :  { %v192_v43 = vsel %vm188_vm9, %v160_v42, 0.0 }
 0x176   :  { %193 = vadd.xlane.f32.xlu1 %v192_v43 }
 0x178   :  { %196 = vadd.xlane.f32.xlu0 %v195_v44 }
 0x179   :  { %v945_v45 = vpop.f32.mrb[4].mxu0 }
 0x17a   :  { %v173_v46 = vpop.f32.mrb[5].mxu0  ;;  %v207_v51 = vsel %vm188_vm9, %v945_v45, 0.0 }
 0x17b   :  { %v946_v47 = vpop.f32.mrb[6].mxu0  ;;  %v201_v49 = vsel %vm188_vm9, %v173_v46, 0.0 }
 0x17c   :  { %199 = vadd.xlane.f32.xlu0 %v198_v48  ;;  %202 = vadd.xlane.f32.xlu1 %v201_v49  ;;  %v176_v50 = vpop.f32.mrb[7].mxu0  ;;  %v210_v53 = vsel %vm188_vm9, %v946_v47, 0.0 }
 0x17d   :  { %v204_v52 = vsel %vm188_vm9, %v176_v50, 0.0 }
 0x180   :  { %208 = vadd.xlane.f32.xlu1 %v207_v51  ;;  %205 = vadd.xlane.f32.xlu0 %v204_v52 }
 0x184   :  { %211 = vadd.xlane.f32.xlu0 %v210_v53 }
 0x201   :  { %v191_v54 = vpop.xlane.xlu0 %190 }
 0x202   :  { %v214_v55 = vmul.f32 0.0625, %v191_v54 }
 0x203   :  { %v194_v56 = vpop.xlane.xlu1 %193 }
 0x204   :  { %v1201_v57 = vsub.f32 %v157_v39, %v214_v55  ;;  %v215_v58 = vmul.f32 0.0625, %v194_v56  ;;  %v36_v39 = vld [vmem:[#allocation2 + $0x48] sm:$0xff] }
 0x205   :  { %v197_v59 = vpop.xlane.xlu0 %196 }
 0x206   :  { %v1203_v60 = vsub.f32 %v160_v42, %v215_v58  ;;  %v216_v61 = vmul.f32 0.0625, %v197_v59  ;;  %v230_v62 = vmul.f32 %v1201_v57, %v1201_v57 }
 0x208   :  { %v1207_v63 = vsub.f32 %v941_v38, %v216_v61  ;;  %v238_v1 = vsel %vm188_vm9, %v230_v62, 0.0  ;;  %v231_v2 = vmul.f32 %v1203_v60, %v1203_v60  ;;  %v35_v38 = vld [vmem:[#allocation2 + $0x40] sm:$0xff] }
 0x209   :  { %v200_v3 = vpop.xlane.xlu0 %199  ;;  %239 = vadd.xlane.f32.xlu1 %v238_v1  ;;  %v203_v4 = vpop.xlane.xlu1 %202 }
 0x20a   :  { %v217_v5 = vmul.f32 0.0625, %v200_v3  ;;  %v218_v6 = vmul.f32 0.0625, %v203_v4  ;;  %v241_v7 = vsel %vm188_vm9, %v231_v2, 0.0  ;;  %v232_v8 = vmul.f32 %v1207_v63, %v1207_v63  ;;  %v880_v3 = vld [vmem:[#allocation2 + $0x70] ss:$0 sm:$0xff] }
 0x20b   :  { %242 = vadd.xlane.f32.xlu0 %v241_v7 }
 0x20c   :  { %v1215_v9 = vsub.f32 %v942_v40, %v217_v5  ;;  %v1217_v10 = vsub.f32 %v173_v46, %v218_v6  ;;  %v244_v11 = vsel %vm188_vm9, %v232_v8, 0.0  ;;  %v1246_v40 = vpack.c.bf16 %v36_v39, %v35_v38 }
 0x20d   :  { %245 = vadd.xlane.f32.xlu1 %v244_v11  ;;  %v209_v12 = vpop.xlane.xlu1 %208  ;;  %v206_v13 = vpop.xlane.xlu0 %205 }
 0x20e   :  { %v220_v14 = vmul.f32 0.0625, %v209_v12  ;;  %v219_v16 = vmul.f32 0.0625, %v206_v13  ;;  %v234_v17 = vmul.f32 %v1217_v10, %v1217_v10  ;;  %v233_v18 = vmul.f32 %v1215_v9, %v1215_v9  ;;  %968 = vmatpush3.bf16.msra.mxu0 %v1246_v40 }
 0x20f   :  { %981 = vmatprep.subr.bf16.mxu0 %v1124_v15 }
 0x210   :  { %v1224_v19 = vsub.f32 %v945_v45, %v220_v14  ;;  %v1226_v20 = vsub.f32 %v176_v50, %v219_v16  ;;  %v250_v21 = vsel %vm188_vm9, %v234_v17, 0.0  ;;  %v247_v22 = vsel %vm188_vm9, %v233_v18, 0.0  ;;  %v881_v14 = vld [vmem:[#allocation2 + $0x71] ss:$0 sm:$0xff] }
 0x211   :  { %251 = vadd.xlane.f32.xlu1 %v250_v21  ;;  %248 = vadd.xlane.f32.xlu0 %v247_v22  ;;  %v212_v23 = vpop.xlane.xlu0 %211 }
 0x212   :  { %v221_v24 = vmul.f32 0.0625, %v212_v23  ;;  %v236_v25 = vmul.f32 %v1224_v19, %v1224_v19  ;;  %v235_v26 = vmul.f32 %v1226_v20, %v1226_v20 }
 0x214   :  { %v1234_v27 = vsub.f32 %v946_v47, %v221_v24  ;;  %v256_v28 = vsel %vm188_vm9, %v236_v25, 0.0  ;;  %v253_v29 = vsel %vm188_vm9, %v235_v26, 0.0 }
 0x215   :  { %257 = vadd.xlane.f32.xlu1 %v256_v28  ;;  %254 = vadd.xlane.f32.xlu0 %v253_v29 }
 0x216   :  { %v237_v30 = vmul.f32 %v1234_v27, %v1234_v27 }
 0x218   :  { %v259_v31 = vsel %vm188_vm9, %v237_v30, 0.0 }
 0x219   :  { %260 = vadd.xlane.f32.xlu0 %v259_v31 }
 0x296   :  { %v240_v41 = vpop.xlane.xlu1 %239 }
 0x297   :  { %v262_v42 = vmul.f32 0.0625, %v240_v41 }
 0x298   :  { %v243_v43 = vpop.xlane.xlu0 %242 }
 0x299   :  { %v270_v44 = vadd.f32 1e-05, %v262_v42  ;;  %v263_v45 = vmul.f32 0.0625, %v243_v43 }
 0x29a   :  { %v246_v46 = vpop.xlane.xlu1 %245 }
 0x29b   :  { %1038 = vrsqrt.f32 %v270_v44  ;;  %v271_v47 = vadd.f32 1e-05, %v263_v45  ;;  %v264_v48 = vmul.f32 0.0625, %v246_v46 }
 0x29d   :  { %1040 = vrsqrt.f32 %v271_v47  ;;  %v272_v49 = vadd.f32 1e-05, %v264_v48 }
 0x29e   :  { %v252_v50 = vpop.xlane.xlu1 %251  ;;  %v249_v51 = vpop.xlane.xlu0 %248 }
 0x29f   :  { %1042 = vrsqrt.f32 %v272_v49  ;;  %v266_v52 = vmul.f32 0.0625, %v252_v50  ;;  %v265_v53 = vmul.f32 0.0625, %v249_v51 }
 0x2a1   :  { %v274_v54 = vadd.f32 1e-05, %v266_v52  ;;  %v273_v55 = vadd.f32 1e-05, %v265_v53 }
 0x2a2   :  { %v258_v56 = vpop.xlane.xlu1 %257  ;;  %v255_v58 = vpop.xlane.xlu0 %254 }
 0x2a3   :  { %1044 = vrsqrt.f32 %v274_v54  ;;  %v268_v59 = vmul.f32 0.0625, %v258_v56  ;;  %v267_v61 = vmul.f32 0.0625, %v255_v58 }
 0x2a4   :  { %1046 = vrsqrt.f32 %v273_v55 }
 0x2a5   :  { %v1039_v62 = vpop.eup %1038  ;;  %v276_v1 = vadd.f32 1e-05, %v268_v59  ;;  %v275_v2 = vadd.f32 1e-05, %v267_v61 }
 0x2a6   :  { %v261_v4 = vpop.xlane.xlu0 %260  ;;  %v286_v5 = vmul.f32 %v1039_v62, %v1201_v57 }
 0x2a7   :  { %v1041_v6 = vpop.eup %1040  ;;  %1048 = vrsqrt.f32 %v276_v1  ;;  %v269_v7 = vmul.f32 0.0625, %v261_v4 }
 0x2a8   :  { %1050 = vrsqrt.f32 %v275_v2  ;;  %v287_v8 = vmul.f32 %v1041_v6, %v1203_v60  ;;  %v298_v11 = vmul.f32 %v880_v3, %v286_v5 }
 0x2a9   :  { %v1043_v12 = vpop.eup %1042  ;;  %v277_v13 = vadd.f32 1e-05, %v269_v7 }
 0x2aa   :  { %v299_v16 = vmul.f32 %v880_v3, %v287_v8  ;;  %v288_v17 = vmul.f32 %v1043_v12, %v1207_v63  ;;  %v310_v18 = vadd.f32 %v881_v14, %v298_v11 }
 0x2ab   :  { %1052 = vrsqrt.f32 %v277_v13 }
 0x2ac   :  { %v311_v21 = vadd.f32 %v881_v14, %v299_v16  ;;  %v300_v26 = vmul.f32 %v880_v3, %v288_v17 }
 0x2ad   :  { %v1045_v22 = vpop.eup %1044 }
 0x2ae   :  { %v1047_v23 = vpop.eup %1046  ;;  %v318_v24 = vpack.c.bf16 %v311_v21, %v310_v18  ;;  %v290_v57 = vmul.f32 %v1045_v22, %v1217_v10  ;;  %v312_v31 = vadd.f32 %v881_v14, %v300_v26 }
 0x2af   :  { %v289_v25 = vmul.f32 %v1047_v23, %v1215_v9 }
 0x2b0   :  { %949 = vmatprep.mubr.msk.bf16.mxu1 %vm188_vm9, %v318_v24  ;;  %v302_v33 = vmul.f32 %v880_v3, %v290_v57 }
 0x2b1   :  { %v1049_v60 = vpop.eup %1048  ;;  %v301_v28 = vmul.f32 %v880_v3, %v289_v25 }
 0x2b2   :  { %v1051_v29 = vpop.eup %1050  ;;  %v292_v30 = vmul.f32 %v1049_v60, %v1224_v19  ;;  %v314_v9 = vadd.f32 %v881_v14, %v302_v33 }
 0x2b3   :  { %v291_v63 = vmul.f32 %v1051_v29, %v1226_v20  ;;  %v313_v32 = vadd.f32 %v881_v14, %v301_v28 }
 0x2b4   :  { %v304_v38 = vmul.f32 %v880_v3, %v292_v30 }
 0x2b5   :  { %v1053_v34 = vpop.eup %1052  ;;  %v319_v35 = vpack.c.bf16 %v313_v32, %v312_v31  ;;  %v303_v36 = vmul.f32 %v880_v3, %v291_v63 }
 0x2b6   :  { %v293_v10 = vmul.f32 %v1053_v34, %v1234_v27  ;;  %v316_v19 = vadd.f32 %v881_v14, %v304_v38 }
 0x2b7   :  { %950 = vmatmul.mubr.msk.bf16.vlgmr.msra.gmra.mrb[0].mxu1 %vm188_vm9, %v319_v35  ;;  %v315_v39 = vadd.f32 %v881_v14, %v303_v36 }
 0x2b8   :  { %958 = vmatpush3.bf16.msra.mxu1 %v1242_v37  ;;  %v305_v41 = vmul.f32 %v880_v3, %v293_v10 }
 0x2b9   :  { %v320_v42 = vpack.c.bf16 %v315_v39, %v314_v9  ;;  %959 = vmatprep.subr.bf16.mxu1 %v1124_v15 }
 0x2ba   :  { %v317_v20 = vadd.f32 %v881_v14, %v305_v41 }
 0x2bb   :  { %953 = vmatprep.mubr.msk.bf16.mxu1 %vm188_vm9, %v320_v42 }
 0x2bc   :  { %v321_v43 = vpack.c.bf16 %v317_v20, %v316_v19  ;;  %960 = vmatpush3.bf16.msra.mxu1 %v1246_v40 }
 0x2bd   :  { %973 = vmatprep.subr.bf16.mxu1 %v1124_v15 }
 0x2bf   :  { %954 = vmatmul.mubr.msk.bf16.gmra.mrb[4].mxu1 %vm188_vm9, %v321_v43 }
 0x2c0   :  { %961 = vmatprep.mubr.msk.bf16.mxu1 %vm1125_vm10, %v1124_v15 }
 0x2c7   :  { %962 = vmatmul.mubr.bf16.vlgmr.msra.gmra.mrb[8].mxu1 %v1123_v0 }
 0x2c8   :  { %974 = vmatpush3.bf16.msra.mxu1 %v1242_v37  ;;  %977 = vmatprep.mubr.msk.bf16.mxu1 %vm1125_vm10, %v1124_v15 }
 0x2c9   :  { %975 = vmatprep.subr.bf16.mxu1 %v1124_v15 }
 0x2cc   :  { %976 = vmatpush3.bf16.msra.mxu1 %v1246_v40 }
 0x2cd   :  { %989 = vmatprep.subr.bf16.mxu1 %v1124_v15 }
 0x38a   :  { %v951_v27 = vpop.f32.mrb[0].mxu1 }
 0x38b   :  { %v369_v44 = vpop.f32.mrb[1].mxu1 }
 0x38c   :  { %v952_v45 = vpop.f32.mrb[2].mxu1 }
 0x38d   :  { %v372_v46 = vpop.f32.mrb[3].mxu1 }
 0x392   :  { %v1277_v47 = vpop.f32.mrb[4].mxu1 }
 0x393   :  { %v1279_v48 = vpop.f32.mrb[5].mxu1 }
 0x394   :  { %v1281_v0 = vpop.f32.mrb[6].mxu1 }
 0x395   :  { %v1283_v49 = vpop.f32.mrb[7].mxu1 }
 0x39a   :  { %v439_v50 = vpop.f32.mrb[8].mxu1 }
 0x39b   :  { %v445_v51 = vadd.f32 %v439_v50, %v369_v44  ;;  %v963_v52 = vpop.f32.mrb[9].mxu1 }
 0x39c   :  { %v442_v53 = vpop.f32.mrb[10].mxu1 }
 0x39d   :  { %1054 = vtanh.f32 %v445_v51  ;;  %v964_v54 = vpop.f32.mrb[11].mxu1 }
 0x3a7   :  { %v1055_v55 = vpop.eup %1054 }
 0x3a8   :  { %v448_v56 = vpack.c.bf16 %v1055_v55, %v1055_v55 }
 0x3aa   :  { %970 = vmatmul.mubr.msk.bf16.vlgmr.msra.gmra.mrb[8].mxu0 %vm110_vm4, %v448_v56 }
 0x3ab   :  { %982 = vmatpush3.bf16.msra.mxu0 %v1242_v37  ;;  %985 = vmatprep.mubr.msk.bf16.mxu0 %vm1125_vm10, %v1124_v15 }
 0x3ac   :  { %983 = vmatprep.subr.bf16.mxu0 %v1124_v15 }
 0x3af   :  { %984 = vmatpush3.bf16.msra.mxu0 %v1246_v40 }
 0x3b0   :  { %997 = vmatprep.subr.bf16.mxu0 %v1124_v15 }
 0x47d   :  { %v486_v58 = vpop.f32.mrb[8].mxu0 }
 0x47e   :  { %v492_v59 = vadd.f32 %v486_v58, %v372_v46  ;;  %v971_v61 = vpop.f32.mrb[9].mxu0  ;;  %v37_v58 = vld [vmem:[#allocation2 + $0x50] sm:$0xff] }
 0x47f   :  { %v489_v62 = vpop.f32.mrb[10].mxu0  ;;  %v39_v61 = vld [vmem:[#allocation2 + $0x60] sm:$0xff] }
 0x480   :  { %1056 = vtanh.f32 %v492_v59  ;;  %v972_v1 = vpop.f32.mrb[11].mxu0  ;;  %v38_v59 = vld [vmem:[#allocation2 + $0x58] sm:$0xff]  ;;  %v40_v62 = vld [vmem:[#allocation2 + $0x68] sm:$0xff] }
 0x481   :  { %v804_v1 = vpack.c.bf16 %v40_v62, %v39_v61 }
 0x48a   :  { %v1057_v2 = vpop.eup %1056 }
 0x48b   :  { %v495_v3 = vpack.c.bf16 %v1057_v2, %v1057_v2  ;;  %v494_v11 = vadd.f32 %v1057_v2, %v1055_v55 }
 0x48d   :  { %978 = vmatmul.mubr.msk.bf16.vlgmr.msra.gmra.mrb[12].mxu1 %vm110_vm4, %v495_v3 }
 0x48e   :  { %990 = vmatpush3.bf16.msra.mxu1 %v1242_v37  ;;  %993 = vmatprep.mubr.msk.bf16.mxu1 %vm1125_vm10, %v1124_v15 }
 0x48f   :  { %991 = vmatprep.subr.bf16.mxu1 %v1124_v15 }
 0x492   :  { %992 = vmatpush3.bf16.msra.mxu1 %v1246_v40 }
 0x493   :  { %1005 = vmatprep.subr.bf16.mxu1 %v1124_v15 }
 0x560   :  { %v533_v4 = vpop.f32.mrb[12].mxu1 }
 0x561   :  { %v539_v5 = vadd.f32 %v951_v27, %v533_v4  ;;  %v979_v6 = vpop.f32.mrb[13].mxu1 }
 0x562   :  { %v536_v7 = vpop.f32.mrb[14].mxu1  ;;  %v893_v6 = vld [vmem:[#allocation2 + $0x72] ss:$0 sm:$0xff] }
 0x563   :  { %1058 = vtanh.f32 %v539_v5  ;;  %v980_v8 = vpop.f32.mrb[15].mxu1 }
 0x564   :  { %v894_v8 = vld [vmem:[#allocation2 + $0x73] ss:$0 sm:$0xff] }
 0x56d   :  { %v1059_v12 = vpop.eup %1058 }
 0x56e   :  { %v541_v13 = vadd.f32 %v1059_v12, %v494_v11  ;;  %v542_v14 = vpack.c.bf16 %v1059_v12, %v1059_v12 }
 0x570   :  { %986 = vmatmul.mubr.msk.bf16.vlgmr.msra.gmra.mrb[12].mxu0 %vm110_vm4, %v542_v14  ;;  %v895_v14 = vld [vmem:[#allocation2 + $0x74] ss:$0 sm:$0xff] }
 0x571   :  { %998 = vmatpush3.bf16.msra.mxu0 %v1242_v37  ;;  %1001 = vmatprep.mubr.msk.bf16.mxu0 %vm1125_vm10, %v1124_v15 }
 0x572   :  { %999 = vmatprep.subr.bf16.mxu0 %v1124_v15 }
 0x575   :  { %1000 = vmatpush3.bf16.msra.mxu0 %v1246_v40 }
 0x576   :  { %1013 = vmatprep.subr.bf16.mxu0 %v1124_v15 }
 0x643   :  { %v580_v16 = vpop.f32.mrb[12].mxu0 }
 0x644   :  { %v586_v17 = vadd.f32 %v952_v45, %v580_v16  ;;  %v987_v18 = vpop.f32.mrb[13].mxu0 }
 0x645   :  { %v583_v21 = vpop.f32.mrb[14].mxu0 }
 0x646   :  { %1060 = vtanh.f32 %v586_v17  ;;  %v988_v22 = vpop.f32.mrb[15].mxu0 }
 0x650   :  { %v1061_v23 = vpop.eup %1060 }
 0x651   :  { %v589_v24 = vpack.c.bf16 %v1061_v23, %v1061_v23  ;;  %v588_v57 = vadd.f32 %v1061_v23, %v541_v13 }
 0x653   :  { %994 = vmatmul.mubr.msk.bf16.vlgmr.msra.gmra.mrb[16].mxu1 %vm110_vm4, %v589_v24 }
 0x654   :  { %1006 = vmatpush3.bf16.msra.mxu1 %v1242_v37  ;;  %1009 = vmatprep.mubr.msk.bf16.mxu1 %vm1125_vm10, %v1124_v15 }
 0x655   :  { %1007 = vmatprep.subr.bf16.mxu1 %v1124_v15 }
 0x658   :  { %1008 = vmatpush3.bf16.msra.mxu1 %v1246_v40 }
 0x659   :  { %1021 = vmatprep.subr.bf16.mxu1 %v1124_v15 }
 0x726   :  { %v627_v25 = vpop.f32.mrb[16].mxu1 }
 0x727   :  { %v633_v26 = vadd.f32 %v627_v25, %v1279_v48  ;;  %v995_v60 = vpop.f32.mrb[17].mxu1 }
 0x728   :  { %v630_v28 = vpop.f32.mrb[18].mxu1 }
 0x729   :  { %1062 = vtanh.f32 %v633_v26  ;;  %v996_v29 = vpop.f32.mrb[19].mxu1 }
 0x733   :  { %v1063_v30 = vpop.eup %1062 }
 0x734   :  { %v636_v63 = vpack.c.bf16 %v1063_v30, %v1063_v30  ;;  %v635_v31 = vadd.f32 %v1063_v30, %v588_v57 }
 0x736   :  { %1002 = vmatmul.mubr.msk.bf16.vlgmr.msra.gmra.mrb[16].mxu0 %vm110_vm4, %v636_v63 }
 0x737   :  { %1014 = vmatpush3.bf16.msra.mxu0 %v1242_v37  ;;  %1017 = vmatprep.mubr.msk.bf16.mxu0 %vm1125_vm10, %v1124_v15 }
 0x738   :  { %1015 = vmatprep.subr.bf16.mxu0 %v1124_v15 }
 0x73b   :  { %1016 = vmatpush3.bf16.msra.mxu0 %v1246_v40 }
 0x809   :  { %v674_v32 = vpop.f32.mrb[16].mxu0 }
 0x80a   :  { %v680_v33 = vadd.f32 %v674_v32, %v1283_v49  ;;  %v1003_v34 = vpop.f32.mrb[17].mxu0 }
 0x80b   :  { %v677_v35 = vpop.f32.mrb[18].mxu0 }
 0x80c   :  { %1064 = vtanh.f32 %v680_v33  ;;  %v1004_v36 = vpop.f32.mrb[19].mxu0 }
 0x816   :  { %v1065_v10 = vpop.eup %1064 }
 0x817   :  { %v683_v38 = vpack.c.bf16 %v1065_v10, %v1065_v10  ;;  %v682_v9 = vadd.f32 %v1065_v10, %v635_v31 }
 0x819   :  { %1010 = vmatmul.mubr.msk.bf16.vlgmr.msra.gmra.mrb[20].mxu1 %vm110_vm4, %v683_v38 }
 0x81a   :  { %1025 = vmatprep.mubr.msk.bf16.mxu1 %vm1125_vm10, %v1124_v15 }
 0x8ec   :  { %v721_v37 = vpop.f32.mrb[20].mxu1 }
 0x8ed   :  { %v727_v39 = vadd.f32 %v1277_v47, %v721_v37  ;;  %v1011_v41 = vpop.f32.mrb[21].mxu1 }
 0x8ee   :  { %v724_v40 = vpop.f32.mrb[22].mxu1 }
 0x8ef   :  { %1066 = vtanh.f32 %v727_v39  ;;  %v1012_v42 = vpop.f32.mrb[23].mxu1 }
 0x8f9   :  { %v1067_v19 = vpop.eup %1066 }
 0x8fa   :  { %v730_v20 = vpack.c.bf16 %v1067_v19, %v1067_v19  ;;  %v729_v43 = vadd.f32 %v1067_v19, %v682_v9 }
 0x8fc   :  { %1018 = vmatmul.mubr.msk.bf16.vlgmr.msra.gmra.mrb[20].mxu0 %vm110_vm4, %v730_v20 }
 0x9cf   :  { %v768_v27 = vpop.f32.mrb[20].mxu0 }
 0x9d0   :  { %v774_v44 = vadd.f32 %v1281_v0, %v768_v27  ;;  %v1019_v45 = vpop.f32.mrb[21].mxu0  ;;  %v803_v0 = vpack.c.bf16 %v38_v59, %v37_v58 }
 0x9d1   :  { %v771_v46 = vpop.f32.mrb[22].mxu0 }
 0x9d2   :  { %1068 = vtanh.f32 %v774_v44  ;;  %v1020_v48 = vpop.f32.mrb[23].mxu0  ;;  %1022 = vmatpush3.bf16.msra.mxu1 %v803_v0 }
 0x9d3   :  { %1023 = vmatprep.subr.bf16.mxu1 %v1124_v15 }
 0x9d6   :  { %1024 = vmatpush3.bf16.msra.mxu1 %v804_v1 }
 0x9dc   :  { %v1069_v49 = vpop.eup %1068 }
 0x9dd   :  { %v776_v50 = vadd.f32 %v1069_v49, %v729_v43 }
 0x9df   :  { %v777_v51 = vmul.f32 0.125, %v776_v50 }
 0x9e1   :  { %v778_v47 = vsel %vm110_vm4, %v777_v51, 0.0 }
 0x9e2   :  { %779 = vadd.xlane.f32.xlu1 %v778_v47 }
 0xa6f   :  { %v780_v52 = vpop.xlane.xlu1 %779 }
 0xa70   :  { %v782_v53 = vmul.f32 0.03125, %v780_v52 }
 0xa72   :  { %v783_v54 = vsub.f32 %v777_v51, %v782_v53 }
 0xa74   :  { %v784_v55 = vmul.f32 %v783_v54, %v783_v54 }
 0xa76   :  { %v785_v56 = vsel %vm110_vm4, %v784_v55, 0.0 }
 0xa77   :  { %786 = vadd.xlane.f32.xlu0 %v785_v56 }
 0xb04   :  { %v787_v2 = vpop.xlane.xlu0 %786 }
 0xb05   :  { %v788_v3 = vmul.f32 0.03125, %v787_v2 }
 0xb07   :  { %v789_v4 = vadd.f32 1e-05, %v788_v3 }
 0xb09   :  { %1070 = vrsqrt.f32 %v789_v4 }
 0xb13   :  { %v1071_v5 = vpop.eup %1070 }
 0xb14   :  { %v791_v7 = vmul.f32 %v1071_v5, %v783_v54 }
 0xb16   :  { %v796_v11 = vmul.f32 %v893_v6, %v791_v7 }
 0xb18   :  { %v801_v12 = vadd.f32 %v894_v8, %v796_v11 }
 0xb1a   :  { %v802_v13 = vpack.c.bf16 %v801_v12, %v801_v12 }
 0xb1c   :  { %1026 = vmatmul.mubr.msk.bf16.vlgmr.msra.gmra.mrb[24].mxu1 %vm110_vm4, %v802_v13 }
 0xbef   :  { %v846_v15 = vpop.f32.mrb[24].mxu1 }
 0xbf0   :  { %v847_v16 = vadd.f32 %v895_v14, %v846_v15  ;;  %v1027_v17 = vpop.f32.mrb[25].mxu1 }
 0xbf1   :  { %v849_v18 = vpop.f32.mrb[26].mxu1 }
 0xbf2   :  { %852 = vst [vmem:[#allocation5] sm:$0xff] %v847_v16  ;;  %v1028_v21 = vpop.f32.mrb[27].mxu1 }
 0xbf3   :  { %1105 = shalt.err (!%p1102_p12)
}
 0xbf4   :  { %s1106_s14 = scalar_lea.hbm %s1345_s2, 128 }
 0xbf5   :  { %p1107_p13 = scmp.ne.s32.totalorder %s1345_s2, %s1106_s14  ;;  %p1110_p0 = scmp.lt.u32.totalorder %s1106_s14, %s1345_s2 }
 0xbf7   :  { %p1112_p1 = pnand %p1110_p0, %p1107_p13 }
 0xbf9   :  { %1115 = shalt.err (!%p1112_p1)
}
 0xbfa   :  { %862 = dma.vmem_to_hbm [thread:$0]  %s860_s10, 128, %s1345_s2, [#allocation4]  }
 0xbfb   :  { %1118 = dma.done.wait [#allocation4], 128  }
 0xbfc   :  { %1119 = vsyncadd [#allocation4], 4294967168 }
 0xbfd   :  { %866 = vsyncpa [#allocation3], 1 }
 0xbfe   :  { %867 = vsyncpa [#allocation4], 1 }

</bundles_post_ra>
